<compile_context>
chip_gen: v5e
topology: v5e:2x2
jax: 0.10.0
libtpu: 0.0.40
codegen_flags: <defaults>
</compile_context>

<pallas_src>
import numpy as np
import jax
import jax.numpy as jnp
from jax.experimental import pallas as pl
from jax.experimental.pallas import tpu as pltpu

SIZES = (2, 3, 6, 14)                      # PSPModule default pyramid sizes
S2_PAD = 256                               # concatenated s^2 axis (245) padded to lane width


# ---------------------------------------------------------------------------
# Host-side numpy constants: fixed pooling / bilinear operators (not hot path)
# ---------------------------------------------------------------------------
def adaptive_pool_matrix(L, s):
    """1-D AdaptiveAvgPool operator P of shape (s, L): pooled = P @ x."""
    P = np.zeros((s, L), dtype=np.float32)
    for i in range(s):
        start = (i * L) // s
        end = -(-((i + 1) * L) // s)       # ceil((i+1)*L/s)
        P[i, start:end] = 1.0 / float(end - start)
    return P


def bilinear_matrix(out_size, in_size):
    """1-D bilinear upsample operator (out, in), align_corners=False."""
    U = np.zeros((out_size, in_size), dtype=np.float32)
    if in_size == 1:
        U[:, 0] = 1.0
        return U
    scale = in_size / out_size
    for i in range(out_size):
        src = max(scale * (i + 0.5) - 0.5, 0.0)
        i0 = min(int(np.floor(src)), in_size - 1)
        i1 = min(i0 + 1, in_size - 1)
        frac = src - i0
        U[i, i0] += 1.0 - frac
        U[i, i1] += frac
    return U


def build_concat_factors(H, W, sizes, hw_pad):
    """Stage-concatenated low-rank spatial factors.

    Pt_cat : (hw_pad, S2_PAD)   Mt_cat : (S2_PAD, hw_pad)
    Padded rows/cols are zero -> they contribute exactly nothing.
    """
    HW = H * W
    Pt = np.zeros((hw_pad, S2_PAD), dtype=np.float32)
    Mt = np.zeros((S2_PAD, hw_pad), dtype=np.float32)
    off = 0
    for s in sizes:
        P = np.kron(adaptive_pool_matrix(H, s), adaptive_pool_matrix(W, s))   # (s^2, HW)
        M = np.kron(bilinear_matrix(H, s), bilinear_matrix(W, s))             # (HW, s^2)
        Pt[:HW, off:off + s * s] = P.T
        Mt[off:off + s * s, :HW] = M.T
        off += s * s
    return Pt, Mt


# ---------------------------------------------------------------------------
# Phase 1 kernel: pooled_cat accumulated over HW tiles -> z_cat (tiny output)
# ---------------------------------------------------------------------------
def make_z_kernel(num_stages, s2_sizes, s2_pad):
    offs, o = [], 0
    for s2 in s2_sizes:
        offs.append(o)
        o += s2

    def kernel(x_ref, pt_ref, wst_ref, z_ref, pooled_ref):
        h = pl.program_id(1)

        @pl.when(h == 0)
        def _init():
            pooled_ref[...] = jnp.zeros_like(pooled_ref)

        # ONE fused pooling matmul per HW tile (all 4 stages at once).
        pooled_ref[...] += jnp.dot(x_ref[0], pt_ref[...],
                                   preferred_element_type=jnp.float32)

        @pl.when(h == pl.num_programs(1) - 1)
        def _finalize():
            pooled = pooled_ref[...]                        # (C, S2_PAD) f32
            for s in range(num_stages):                     # static unroll, tiny matmuls
                off = offs[s]
                # last stage also covers the zero padding (pooled there is exactly 0)
                width = (s2_pad - off) if s == num_stages - 1 else s2_sizes[s]
                p_s = pooled[:, off:off + width].astype(jnp.bfloat16)
                z_s = jnp.dot(wst_ref[s], p_s, preferred_element_type=jnp.float32)
                z_ref[0, :, off:off + width] = z_s.astype(z_ref.dtype)

    return kernel


# ---------------------------------------------------------------------------
# Phase 2 kernel: hot lane-dense matmuls + fused bias/ReLU epilogue (no scratch)
# ---------------------------------------------------------------------------
def psp_fused_kernel(x_ref, z_ref, mt_ref, wraw_ref, bias_ref, o_ref):
    # Raw-feature branch of the bottleneck conv: (OUT, C) @ (C, T)
    acc = jnp.dot(wraw_ref[...], x_ref[0], preferred_element_type=jnp.float32)
    # All pyramid branches at once via the concatenated upsample factor.
    acc = acc + jnp.dot(z_ref[0], mt_ref[...], preferred_element_type=jnp.float32)
    # SSA accumulation -> single bf16 store (no f32 VMEM accumulator pass).
    o_ref[0] = jnp.maximum(acc + bias_ref[...], 0.0).astype(o_ref.dtype)


# ---------------------------------------------------------------------------
# Wrapper
# ---------------------------------------------------------------------------
def psp_forward(x_nchw, w_stages, w_bottle, b_bottle, out_features,
                sizes=SIZES, hw_tile=None):
    B, C, H, W = x_nchw.shape
    HW = H * W
    NS = len(sizes)
    s2_sizes = [s * s for s in sizes]

    if hw_tile is None:
        hw_tile = 128 if HW <= 2048 else 512        # lane-dense, multiple of 128
    n_hw = pl.cdiv(HW, hw_tile)
    HW_pad = n_hw * hw_tile

    # Constant spatial factors (bf16 MXU operands).
    Pt_np, Mt_np = build_concat_factors(H, W, sizes, HW_pad)
    pt_cat = jnp.asarray(Pt_np).astype(jnp.bfloat16)            # (HW_pad, S2_PAD)
    mt_cat = jnp.asarray(Mt_np).astype(jnp.bfloat16)            # (S2_PAD, HW_pad)

    # Channel-first flattened spatial: reshape + zero-pad only, no transpose.
    x_flat = x_nchw.reshape(B, C, HW)
    if HW_pad != HW:
        x_flat = jnp.pad(x_flat, ((0, 0), (0, 0), (0, HW_pad - HW)))
    x_flat = x_flat.astype(jnp.bfloat16)                        # (B, C, HW_pad)

    # Bottleneck 1x1 conv split per concat branch; fold each stage's bias-free
    # 1x1 conv into its slice:  W_eff_s = Wb_s @ Wstage_s  (exact, path is linear).
    wb_blocks = jnp.transpose(w_bottle.reshape(out_features, NS + 1, C), (1, 0, 2))
    wst = jnp.stack([wb_blocks[s] @ w_stages[s] for s in range(NS)],
                    axis=0).astype(jnp.bfloat16)                # (NS, OUT, C)
    w_raw = wb_blocks[NS].astype(jnp.bfloat16)                  # (OUT, C)
    bias = b_bottle.reshape(out_features, 1).astype(jnp.float32)

    nbytes = lambda a: int(a.size) * a.dtype.itemsize
    z_bytes = B * out_features * S2_PAD * 2
    out_bytes = B * out_features * HW_pad * 2

    def vmem_limit(per_step_block_bytes, scratch_bytes=0):
        # double-buffered pipeline blocks + scratch + compiler headroom,
        # floored at the 32 MiB scoped default (on v7x cap nearer ~56 MiB).
        need = 2 * per_step_block_bytes + scratch_bytes + (8 << 20)
        return int(min(max(need, 32 << 20), 96 << 20))

    # ----------------- Phase 1: z_cat (B, OUT, S2_PAD), tiny ----------------
    blk1 = (C * hw_tile * 2 + hw_tile * S2_PAD * 2
            + NS * out_features * C * 2 + out_features * S2_PAD * 2)
    z_cat = pl.pallas_call(
        make_z_kernel(NS, s2_sizes, S2_PAD),
        out_shape=jax.ShapeDtypeStruct((B, out_features, S2_PAD), jnp.bfloat16),
        grid_spec=pltpu.PrefetchScalarGridSpec(
            num_scalar_prefetch=0,
            grid=(B, n_hw),
            in_specs=[
                pl.BlockSpec((1, C, hw_tile), lambda b, h: (b, 0, h)),         # x tile
                pl.BlockSpec((hw_tile, S2_PAD), lambda b, h: (h, 0)),          # pooling factor tile
                pl.BlockSpec((NS, out_features, C), lambda b, h: (0, 0, 0)),   # folded stage weights (invariant)
            ],
            out_specs=pl.BlockSpec((1, out_features, S2_PAD), lambda b, h: (b, 0, 0)),
            scratch_shapes=[pltpu.VMEM((C, S2_PAD), jnp.float32)],             # pooled accumulator
        ),
        compiler_params=pltpu.CompilerParams(
            dimension_semantics=("parallel", "arbitrary"),    # hw axis is a reduction
            vmem_limit_bytes=vmem_limit(blk1, C * S2_PAD * 4),
        ),
        cost_estimate=pl.CostEstimate(
            flops=2 * B * (C * HW_pad * S2_PAD
                           + sum(out_features * C * s2 for s2 in s2_sizes)),
            transcendentals=0,
            bytes_accessed=nbytes(x_flat) + nbytes(pt_cat) + nbytes(wst) + z_bytes,
        ),
    )(x_flat, pt_cat, wst)

    # ----------------- Phase 2: fused bottleneck over HW tiles --------------
    blk2 = (C * hw_tile * 2 + out_features * S2_PAD * 2 + S2_PAD * hw_tile * 2
            + out_features * C * 2 + out_features * 4 + out_features * hw_tile * 2)
    out = pl.pallas_call(
        psp_fused_kernel,
        out_shape=jax.ShapeDtypeStruct((B, out_features, HW_pad), jnp.bfloat16),
        grid_spec=pltpu.PrefetchScalarGridSpec(
            num_scalar_prefetch=0,
            grid=(B, n_hw),
            in_specs=[
                pl.BlockSpec((1, C, hw_tile), lambda b, h: (b, 0, h)),              # x tile
                pl.BlockSpec((1, out_features, S2_PAD), lambda b, h: (b, 0, 0)),    # z_cat (per-b resident)
                pl.BlockSpec((S2_PAD, hw_tile), lambda b, h: (0, h)),               # upsample factor tile
                pl.BlockSpec((out_features, C), lambda b, h: (0, 0)),               # raw-branch weight (invariant)
                pl.BlockSpec((out_features, 1), lambda b, h: (0, 0)),               # bottleneck bias (invariant)
            ],
            out_specs=pl.BlockSpec((1, out_features, hw_tile), lambda b, h: (b, 0, h)),
        ),
        compiler_params=pltpu.CompilerParams(
            dimension_semantics=("parallel", "parallel"),     # b and hw tiles independent (v7x 2 TCs)
            vmem_limit_bytes=vmem_limit(blk2),
        ),
        cost_estimate=pl.CostEstimate(
            flops=2 * B * HW_pad * out_features * (C + S2_PAD),
            transcendentals=0,
            bytes_accessed=nbytes(x_flat) + z_bytes + nbytes(mt_cat)
                           + nbytes(w_raw) + nbytes(bias) + out_bytes,
        ),
    )(x_flat, z_cat, mt_cat, w_raw, bias)

    return out[:, :, :HW].reshape(B, out_features, H, W)       # NCHW, reshape only


# ---------------------------------------------------------------------------
# Pure-JAX f32 reference (separable pooling / upsampling) for correctness check
# ---------------------------------------------------------------------------
def psp_reference(x_nchw, w_stages, w_bottle, b_bottle, sizes):
    B, C, H, W = x_nchw.shape
    priors = []
    for idx, s in enumerate(sizes):
        Ph, Pw = jnp.asarray(adaptive_pool_matrix(H, s)), jnp.asarray(adaptive_pool_matrix(W, s))
        pooled = jnp.einsum('ph,bchw,qw->bcpq', Ph, x_nchw, Pw)
        conv = jnp.einsum('oc,bcpq->bopq', w_stages[idx], pooled)
        Uh, Uw = jnp.asarray(bilinear_matrix(H, s)), jnp.asarray(bilinear_matrix(W, s))
        priors.append(jnp.einsum('hp,bopq,wq->bohw', Uh, conv, Uw))
    priors.append(x_nchw)
    cat = jnp.concatenate(priors, axis=1)
    out = jnp.einsum('oc,bchw->bohw', w_bottle, cat) + b_bottle[None, :, None, None]
    return jnp.maximum(out, 0.0)


if __name__ == "__main__":
    B, C, H, W = 2, 8, 16, 16          # small demo shapes (HW=256 -> 2 hw tiles of 128)
    OUT = 128                          # out_features (lane-dense)
    NS = len(SIZES)

    key = jax.random.PRNGKey(0)
    k1, k2, k3, k4 = jax.random.split(key, 4)
    x = jax.random.normal(k1, (B, C, H, W), jnp.float32)
    w_stages = jax.random.normal(k2, (NS, C, C), jnp.float32) * 0.1           # stage 1x1 convs (bias-free)
    w_bottle = jax.random.normal(k3, (OUT, C * (NS + 1)), jnp.float32) * 0.1  # bottleneck 1x1 conv
    b_bottle = jax.random.normal(k4, (OUT,), jnp.float32) * 0.1               # bottleneck bias

    out = psp_forward(x, w_stages, w_bottle, b_bottle, OUT)
    out = jax.block_until_ready(out)

    ref = psp_reference(x, w_stages, w_bottle, b_bottle, SIZES)
    # bf16 operands + bf16 output with f32 accumulation -> loosened tolerance.
    np.testing.assert_allclose(np.asarray(out.astype(jnp.float32)), np.asarray(ref),
                               rtol=3e-2, atol=3e-2)
    print("KERNEL_OK")
</pallas_src>

<mosaic_0001>
module attributes {stable_mosaic.version = 11 : i64} {
  func.func @kernel(%arg0: i32, %arg1: i32, %arg2: memref<1x8x128xbf16, #tpu.memory_space<vmem>>, %arg3: memref<128x256xbf16, #tpu.memory_space<vmem>>, %arg4: memref<4x128x8xbf16, #tpu.memory_space<vmem>>, %arg5: memref<1x128x256xbf16, #tpu.memory_space<vmem>>, %arg6: memref<8x256xf32, #tpu.memory_space<vmem>>) attributes {dimension_semantics = [#tpu.dimension_semantics<parallel>, #tpu.dimension_semantics<arbitrary>], iteration_bounds = array<i64: 2, 2>, scalar_prefetch = 0 : i64, scratch_operands = 1 : i64, tpu.core_type = #tpu.core_type<tc>, window_params = [{transform_indices = @transform_0, window_bounds = array<i64: 1, 8, 128>}, {transform_indices = @transform_1, window_bounds = array<i64: 128, 256>}, {pipeline_mode = #tpu.pipeline_mode<synchronous>, transform_indices = @transform_2, window_bounds = array<i64: 4, 128, 8>}, {transform_indices = @transform_3, window_bounds = array<i64: 1, 128, 256>}]} {
    %c0_i32 = arith.constant 0 : i32
    %0 = arith.cmpi eq, %arg1, %c0_i32 : i32
    %1 = arith.extui %0 : i1 to i32
    %c0_i32_0 = arith.constant 0 : i32
    %2 = arith.cmpi ne, %1, %c0_i32_0 : i32
    scf.if %2 {
      %cst_10 = arith.constant 0.000000e+00 : f32
      %13 = vector.broadcast %cst_10 : f32 to vector<8x256xf32>
      %c0_11 = arith.constant 0 : index
      %c0_12 = arith.constant 0 : index
      %14 = vector.load %arg6[%c0_11, %c0_12] : memref<8x256xf32, #tpu.memory_space<vmem>>, vector<8x256xf32>
      tpu.vector_store %arg6[%c0_11, %c0_12], %13 {strides = array<i32>} : memref<8x256xf32, #tpu.memory_space<vmem>>, vector<8x256xf32>,
    } else {
    }
    %c0 = arith.constant 0 : index
    %c0_1 = arith.constant 0 : index
    %3 = vector.load %arg6[%c0, %c0_1] : memref<8x256xf32, #tpu.memory_space<vmem>>, vector<8x256xf32>
    %c0_2 = arith.constant 0 : index
    %c0_3 = arith.constant 0 : index
    %c0_4 = arith.constant 0 : index
    %4 = vector.load %arg2[%c0_2, %c0_3, %c0_4] : memref<1x8x128xbf16, #tpu.memory_space<vmem>>, vector<1x8x128xbf16>
    %5 = vector.shape_cast %4 : vector<1x8x128xbf16> to vector<8x128xbf16>
    %c0_5 = arith.constant 0 : index
    %c0_6 = arith.constant 0 : index
    %6 = vector.load %arg3[%c0_5, %c0_6] : memref<128x256xbf16, #tpu.memory_space<vmem>>, vector<128x256xbf16>
    %cst = arith.constant dense<0.000000e+00> : vector<8x256xf32>
    %7 = tpu.matmul %5, %6, %cst {dimension_numbers = #tpu.dot_dimension_numbers<[1], [0], [0], [1], [0, 0, 1, 1], [], []>} : vector<8x128xbf16>, vector<128x256xbf16>, vector<8x256xf32> -> vector<8x256xf32>
    %8 = arith.addf %3, %7 : vector<8x256xf32>
    %c0_7 = arith.constant 0 : index
    %c0_8 = arith.constant 0 : index
    %9 = vector.load %arg6[%c0_7, %c0_8] : memref<8x256xf32, #tpu.memory_space<vmem>>, vector<8x256xf32>
    tpu.vector_store %arg6[%c0_7, %c0_8], %8 {strides = array<i32>} : memref<8x256xf32, #tpu.memory_space<vmem>>, vector<8x256xf32>,
    %c1_i32 = arith.constant 1 : i32
    %10 = arith.cmpi eq, %arg1, %c1_i32 : i32
    %11 = arith.extui %10 : i1 to i32
    %c0_i32_9 = arith.constant 0 : i32
    %12 = arith.cmpi ne, %11, %c0_i32_9 : i32
    scf.if %12 {
      %c0_10 = arith.constant 0 : index
      %c0_11 = arith.constant 0 : index
      %13 = vector.load %arg6[%c0_10, %c0_11] : memref<8x256xf32, #tpu.memory_space<vmem>>, vector<8x256xf32>
      %14 = vector.extract_strided_slice %13 {offsets = [0, 0], sizes = [8, 4], strides = [1, 1]} : vector<8x256xf32> to vector<8x4xf32>
      %15 = arith.truncf %14 : vector<8x4xf32> to vector<8x4xbf16>
      %c0_12 = arith.constant 0 : index
      %c0_13 = arith.constant 0 : index
      %c0_14 = arith.constant 0 : index
      %16 = vector.load %arg4[%c0_12, %c0_13, %c0_14] : memref<4x128x8xbf16, #tpu.memory_space<vmem>>, vector<1x128x8xbf16>
      %17 = vector.shape_cast %16 : vector<1x128x8xbf16> to vector<128x8xbf16>
      %cst_15 = arith.constant dense<0.000000e+00> : vector<128x4xf32>
      %18 = tpu.matmul %17, %15, %cst_15 {dimension_numbers = #tpu.dot_dimension_numbers<[1], [0], [0], [1], [0, 0, 1, 1], [], []>} : vector<128x8xbf16>, vector<8x4xbf16>, vector<128x4xf32> -> vector<128x4xf32>
      %19 = arith.truncf %18 : vector<128x4xf32> to vector<128x4xbf16>
      %c0_16 = arith.constant 0 : index
      %c0_17 = arith.constant 0 : index
      %c0_18 = arith.constant 0 : index
      %20 = vector.load %arg5[%c0_16, %c0_17, %c0_18] : memref<1x128x256xbf16, #tpu.memory_space<vmem>>, vector<1x128x4xbf16>
      %21 = vector.shape_cast %20 : vector<1x128x4xbf16> to vector<128x4xbf16>
      %22 = vector.shape_cast %19 : vector<128x4xbf16> to vector<1x128x4xbf16>
      tpu.vector_store %arg5[%c0_16, %c0_17, %c0_18], %22 {strides = array<i32>} : memref<1x128x256xbf16, #tpu.memory_space<vmem>>, vector<1x128x4xbf16>,
      %23 = vector.extract_strided_slice %13 {offsets = [0, 4], sizes = [8, 9], strides = [1, 1]} : vector<8x256xf32> to vector<8x9xf32>
      %24 = arith.truncf %23 : vector<8x9xf32> to vector<8x9xbf16>
      %c1 = arith.constant 1 : index
      %c0_19 = arith.constant 0 : index
      %c0_20 = arith.constant 0 : index
      %25 = vector.load %arg4[%c1, %c0_19, %c0_20] : memref<4x128x8xbf16, #tpu.memory_space<vmem>>, vector<1x128x8xbf16>
      %26 = vector.shape_cast %25 : vector<1x128x8xbf16> to vector<128x8xbf16>
      %cst_21 = arith.constant dense<0.000000e+00> : vector<128x9xf32>
      %27 = tpu.matmul %26, %24, %cst_21 {dimension_numbers = #tpu.dot_dimension_numbers<[1], [0], [0], [1], [0, 0, 1, 1], [], []>} : vector<128x8xbf16>, vector<8x9xbf16>, vector<128x9xf32> -> vector<128x9xf32>
      %28 = arith.truncf %27 : vector<128x9xf32> to vector<128x9xbf16>
      %c0_22 = arith.constant 0 : index
      %c0_23 = arith.constant 0 : index
      %c4 = arith.constant 4 : index
      %29 = vector.load %arg5[%c0_22, %c0_23, %c4] : memref<1x128x256xbf16, #tpu.memory_space<vmem>>, vector<1x128x9xbf16>
      %30 = vector.shape_cast %29 : vector<1x128x9xbf16> to vector<128x9xbf16>
      %31 = vector.shape_cast %28 : vector<128x9xbf16> to vector<1x128x9xbf16>
      tpu.vector_store %arg5[%c0_22, %c0_23, %c4], %31 {strides = array<i32>} : memref<1x128x256xbf16, #tpu.memory_space<vmem>>, vector<1x128x9xbf16>,
      %32 = vector.extract_strided_slice %13 {offsets = [0, 13], sizes = [8, 36], strides = [1, 1]} : vector<8x256xf32> to vector<8x36xf32>
      %33 = arith.truncf %32 : vector<8x36xf32> to vector<8x36xbf16>
      %c2 = arith.constant 2 : index
      %c0_24 = arith.constant 0 : index
      %c0_25 = arith.constant 0 : index
      %34 = vector.load %arg4[%c2, %c0_24, %c0_25] : memref<4x128x8xbf16, #tpu.memory_space<vmem>>, vector<1x128x8xbf16>
      %35 = vector.shape_cast %34 : vector<1x128x8xbf16> to vector<128x8xbf16>
      %cst_26 = arith.constant dense<0.000000e+00> : vector<128x36xf32>
      %36 = tpu.matmul %35, %33, %cst_26 {dimension_numbers = #tpu.dot_dimension_numbers<[1], [0], [0], [1], [0, 0, 1, 1], [], []>} : vector<128x8xbf16>, vector<8x36xbf16>, vector<128x36xf32> -> vector<128x36xf32>
      %37 = arith.truncf %36 : vector<128x36xf32> to vector<128x36xbf16>
      %c0_27 = arith.constant 0 : index
      %c0_28 = arith.constant 0 : index
      %c13 = arith.constant 13 : index
      %38 = vector.load %arg5[%c0_27, %c0_28, %c13] : memref<1x128x256xbf16, #tpu.memory_space<vmem>>, vector<1x128x36xbf16>
      %39 = vector.shape_cast %38 : vector<1x128x36xbf16> to vector<128x36xbf16>
      %40 = vector.shape_cast %37 : vector<128x36xbf16> to vector<1x128x36xbf16>
      tpu.vector_store %arg5[%c0_27, %c0_28, %c13], %40 {strides = array<i32>} : memref<1x128x256xbf16, #tpu.memory_space<vmem>>, vector<1x128x36xbf16>,
      %41 = vector.extract_strided_slice %13 {offsets = [0, 49], sizes = [8, 207], strides = [1, 1]} : vector<8x256xf32> to vector<8x207xf32>
      %42 = arith.truncf %41 : vector<8x207xf32> to vector<8x207xbf16>
      %c3 = arith.constant 3 : index
      %c0_29 = arith.constant 0 : index
      %c0_30 = arith.constant 0 : index
      %43 = vector.load %arg4[%c3, %c0_29, %c0_30] : memref<4x128x8xbf16, #tpu.memory_space<vmem>>, vector<1x128x8xbf16>
      %44 = vector.shape_cast %43 : vector<1x128x8xbf16> to vector<128x8xbf16>
      %cst_31 = arith.constant dense<0.000000e+00> : vector<128x207xf32>
      %45 = tpu.matmul %44, %42, %cst_31 {dimension_numbers = #tpu.dot_dimension_numbers<[1], [0], [0], [1], [0, 0, 1, 1], [], []>} : vector<128x8xbf16>, vector<8x207xbf16>, vector<128x207xf32> -> vector<128x207xf32>
      %46 = arith.truncf %45 : vector<128x207xf32> to vector<128x207xbf16>
      %c0_32 = arith.constant 0 : index
      %c0_33 = arith.constant 0 : index
      %c49 = arith.constant 49 : index
      %47 = vector.load %arg5[%c0_32, %c0_33, %c49] : memref<1x128x256xbf16, #tpu.memory_space<vmem>>, vector<1x128x207xbf16>
      %48 = vector.shape_cast %47 : vector<1x128x207xbf16> to vector<128x207xbf16>
      %49 = vector.shape_cast %46 : vector<128x207xbf16> to vector<1x128x207xbf16>
      tpu.vector_store %arg5[%c0_32, %c0_33, %c49], %49 {strides = array<i32>} : memref<1x128x256xbf16, #tpu.memory_space<vmem>>, vector<1x128x207xbf16>,
    } else {
    }
    return
  }
  func.func @transform_0(%arg0: i32, %arg1: i32) -> (i32, i32, i32) {
    %c0_i32 = arith.constant 0 : i32
    %c0_i32_0 = arith.constant 0 : i32
    return %arg0, %c0_i32, %arg1 : i32, i32, i32
  }
  func.func @transform_1(%arg0: i32, %arg1: i32) -> (i32, i32) {
    %c0_i32 = arith.constant 0 : i32
    %c0_i32_0 = arith.constant 0 : i32
    return %arg1, %c0_i32 : i32, i32
  }
  func.func @transform_2(%arg0: i32, %arg1: i32) -> (i32, i32, i32) {
    %c0_i32 = arith.constant 0 : i32
    %c0_i32_0 = arith.constant 0 : i32
    %c0_i32_1 = arith.constant 0 : i32
    %c0_i32_2 = arith.constant 0 : i32
    return %c0_i32, %c0_i32_0, %c0_i32_1 : i32, i32, i32
  }
  func.func @transform_3(%arg0: i32, %arg1: i32) -> (i32, i32, i32) {
    %c0_i32 = arith.constant 0 : i32
    %c0_i32_0 = arith.constant 0 : i32
    %c0_i32_1 = arith.constant 0 : i32
    return %arg0, %c0_i32, %c0_i32_0 : i32, i32, i32
  }
}

</mosaic_0001>

<bundles_post_ra>
// kernel: tpu_custom_call.1
= control target key start
LH: loop header
LB: loop body
LE: loop exit
PB: predicated region body
PF: predicated region fallthrough
CT: control target
= control target key end

     0   :  { %8 = vsyncpa [#allocation4], 0  ;;  %s2502_s0 = inlined_call_operand.vmem [shape: bf16[2,8,256], index: 0, kind: input, shape index: {}]   ;;  %s2503_s1 = inlined_call_operand.vmem [shape: bf16[256,256], index: 1, kind: input, shape index: {}]   ;;  %s2504_s2 = inlined_call_operand.vmem [shape: bf16[4,128,8], index: 2, kind: input, shape index: {}]   ;;  %s2505_s3 = inlined_call_operand.hbm [shape: bf16[2,128,256], index: 3, kind: output, shape index: {}]  }
   0x1   :  { %10 = vsyncpa [#allocation4 + $0x1], 0  ;;  %s1980_s12 = smov 0   ;;  %s1982_s13 = smov 0  }
   0x2   :  { %s1984_s14 = smov 0   ;;  %s1986_s15 = smov 0  }
   0x3   :  { %s1988_s16 = smov 0   ;;  %s1990_s17 = smov 0  }
   0x4   :  { %s1992_s18 = smov 0   ;;  %s1994_s19 = smov 0  }
   0x5 LB: > { %s1424_s20 = sadd.s32 4294967295, %s1949_s19   ;;  %s1425_s21 = sadd.s32 4294967294, %s1949_s19   ;;  %s1949_s19 = sphi %s1994_s19, %s16_s19   ;;  %s1945_s18 = sphi %s1992_s18, %s2521_s18   ;;  %s1941_s17 = sphi %s1990_s17, %s2520_s17   ;;  %s1937_s16 = sphi %s1988_s16, %s2519_s16   ;;  %s1933_s15 = sphi %s1986_s15, %s2518_s15   ;;  %s1929_s14 = sphi %s1984_s14, %s2517_s14   ;;  %s1925_s13 = sphi %s1982_s13, %s2516_s13   ;;  %s1921_s12 = sphi %s1980_s12, %s2515_s12  }
   0x6   : > { %s25_s22 = sadd.s32 1, %s1941_s17  ;;  %s28_s23 = sadd.s32 1, %s1945_s18 }
   0x7   : > { %p26_p0 = scmp.ge.s32.totalorder %s25_s22, 2  ;;  %p120_p1 = scmp.ne.s32.totalorder %s1929_s14, %s1925_s13 }
   0x8   : > { %p121_p2 = scmp.eq.s32.totalorder %s1424_s20, 3  ;;  %p126_p4 = scmp.ne.s32.totalorder %s1925_s13, %s1921_s12 }
   0x9   : > { %s2523_s22 = smov (%p26_p0, %s25_s22), 0  ;;  %s2525_s23 = smov (!%p26_p0, %s28_s23), %s1945_s18 }
   0xa   : > { %p2029_p3 = por %p121_p2, %p120_p1  ;;  %p30_p5 = scmp.ge.s32.totalorder %s2525_s23, 2 }
   0xb   : > { %p127_p6 = scmp.eq.s32.totalorder %s1425_s21, 3  ;;  %p1428_p7 = scmp.ge.s32.totalorder %s1949_s19, 1 }
   0xc   : > { %p169_p8 = scmp.lt.s32.totalorder %s1949_s19, 5  ;;  %s2527_s23 = smov (%p30_p5, %s2525_s23), 0 }
   0xd   : > { %2509 = sst [smem:[#allocation6_spill]] %s2527_s23  ;;  %p2039_p9 = por %p127_p6, %p126_p4 }
   0xe   : > { %p170_p10 = pnand %p1428_p7, %p169_p8  ;;  %s107_s26 = ssub.s32 %s1945_s18, %s2527_s23 }
   0xf   : > { %s110_s27 = sadd.s32 1, %s1929_s14  ;;  %p108_p11 = scmp.eq.s32.totalorder %s107_s26, 0 }
  0x10   : > { %173 = sbr.rel (%p170_p10) target bundleno = 726 (0x2d6), region = 32  ;;  %s2507_s29 = sand.u32 (!%p170_p10), 1, %s1925_s13  }
  0x11   : > { %s2047_s28 = scalar_select %p108_p11, %s1929_s14, %s110_s27  }
  0x12   : > { %p202_p12 = scmp.lt.s32.totalorder (!%p170_p10), %s1937_s16, 1  ;;  %s1429_s30 = sshll.u32 (!%p170_p10), %s2507_s29, 7 }
  0x13   : > { %p204_p13 = scmp.lt.s32.totalorder (!%p170_p10), %s1933_s15, 1  ;;  %s1432_s4 = sshll.u32 (!%p170_p10), %s1933_s15, 4 }
  0x14   : > { %p211_p0 = scmp.lt.s32.totalorder (!%p170_p10), %s1432_s4, 31  ;;  %s2067_s29 = scalar_lea.vmem (!%p170_p10), [#allocation3], %s1429_s30 }
  0x15   : > { %s203_s5 = scalar_select %p202_p12, %s1937_s16, 1 }
  0x16   : > { %s205_s6 = scalar_select %p204_p13, %s1933_s15, 1 }
  0x17   : > { %s1430_s7 = sshll.u32 %s203_s5, 1  ;;  %s2529_s4 = smov (!%p211_p0, %s1432_s4), 31 }
  0x18   : > { %s207_s8 = sadd.s32 %s1430_s7, %s205_s6  ;;  %s1722_s21 = sshll.u32 %s2529_s4, 3 }
  0x19   : > { %s1431_s9 = sshll.u32 %s207_s8, 2  ;;  %s2065_s23 = scalar_lea.vmem %s2503_s1, %s1722_s21 }
  0x1a   : > { %s2060_s20 = scalar_lea.vmem %s2502_s0, %s1431_s9  ;;  %p1435_p1 = scmp.ne.s32.totalorder %s1933_s15, 0 }
  0x1c   : > { %221 = sbr.rel (%p1435_p1) target bundleno = 36 (0x24), region = 36 }
  0x21   : > { %v1951_v0 = vmov 0.0  }
  0x22   : > { %222 = vst [vmem:[#allocation2] sm:$0xff] %v1951_v0 }
  0x23   : > { %223 = vst [vmem:[#allocation2 + $0x8] sm:$0xff] %v1951_v0 }
  0x24 PF: > { %v1494_v1 = vld [vmem:[%s2065_s23 + $0x70] sm:$0xf]  ;;  %v1738_v2 = vld [vmem:[%s2065_s23 + $0x74] sm:$0xf0]  ;;  %v1737_v3 = vld [vmem:[%s2065_s23 + $0x74] sm:$0xf] }
  0x25   : > { %v1495_v4 = vor.u32 %v1738_v2, %v1494_v1  ;;  %v1496_v5 = vld [vmem:[%s2065_s23 + $0x78] sm:$0xf0]  ;;  %v1486_v6 = vld [vmem:[%s2065_s23 + $0x60] sm:$0xf]  ;;  %v1736_v7 = vld [vmem:[%s2065_s23 + $0x64] sm:$0xf0] }
  0x26   : > { %v1499_v8 = vor.u32 %v1737_v3, %v1496_v5  ;;  %v1735_v9 = vld [vmem:[%s2065_s23 + $0x64] sm:$0xf]  ;;  %v1488_v10 = vld [vmem:[%s2065_s23 + $0x68] sm:$0xf0]  ;;  %v1487_v11 = vor.u32 %v1736_v7, %v1486_v6  ;;  %v1478_v13 = vld [vmem:[%s2065_s23 + $0x50] sm:$0xf] }
  0x27   : > { %323 = vmatpush.bf16.msra.mxu0 %v1495_v4  ;;  %v1491_v12 = vor.u32 %v1735_v9, %v1488_v10  ;;  %v1734_v14 = vld [vmem:[%s2065_s23 + $0x54] sm:$0xf0]  ;;  %v1733_v15 = vld [vmem:[%s2065_s23 + $0x54] sm:$0xf]  ;;  %v1480_v16 = vld [vmem:[%s2065_s23 + $0x58] sm:$0xf0] }
  0x28   : > { %336 = vmatpush.bf16.msra.mxu1 %v1499_v8  ;;  %v1479_v17 = vor.u32 %v1734_v14, %v1478_v13  ;;  %v1483_v18 = vor.u32 %v1733_v15, %v1480_v16  ;;  %v1470_v19 = vld [vmem:[%s2065_s23 + $0x40] sm:$0xf]  ;;  %v1732_v20 = vld [vmem:[%s2065_s23 + $0x44] sm:$0xf0]  ;;  %v1731_v21 = vld [vmem:[%s2065_s23 + $0x44] sm:$0xf] }
  0x29   : > { %v1472_v22 = vld [vmem:[%s2065_s23 + $0x48] sm:$0xf0]  ;;  %v1471_v23 = vor.u32 %v1732_v20, %v1470_v19  ;;  %v1462_v25 = vld [vmem:[%s2065_s23 + $0x30] sm:$0xf]  ;;  %v1730_v26 = vld [vmem:[%s2065_s23 + $0x34] sm:$0xf0] }
  0x2a   : > { %v1475_v24 = vor.u32 %v1731_v21, %v1472_v22  ;;  %v1729_v27 = vld [vmem:[%s2065_s23 + $0x34] sm:$0xf]  ;;  %v1464_v28 = vld [vmem:[%s2065_s23 + $0x38] sm:$0xf0]  ;;  %v1463_v29 = vor.u32 %v1730_v26, %v1462_v25  ;;  %v1454_v31 = vld [vmem:[%s2065_s23 + $0x20] sm:$0xf] }
  0x2b   : > { %324 = vmatpush.bf16.msra.mxu0 %v1487_v11  ;;  %v1467_v30 = vor.u32 %v1729_v27, %v1464_v28  ;;  %v1728_v32 = vld [vmem:[%s2065_s23 + $0x24] sm:$0xf0]  ;;  %v1727_v33 = vld [vmem:[%s2065_s23 + $0x24] sm:$0xf]  ;;  %v1456_v34 = vld [vmem:[%s2065_s23 + $0x28] sm:$0xf0] }
  0x2c   : > { %337 = vmatpush.bf16.msra.mxu1 %v1491_v12  ;;  %v1455_v35 = vor.u32 %v1728_v32, %v1454_v31  ;;  %v1459_v36 = vor.u32 %v1727_v33, %v1456_v34  ;;  %v1446_v37 = vld [vmem:[%s2065_s23 + $0x10] sm:$0xf]  ;;  %v1726_v38 = vld [vmem:[%s2065_s23 + $0x14] sm:$0xf0]  ;;  %v1725_v39 = vld [vmem:[%s2065_s23 + $0x14] sm:$0xf] }
  0x2d   : > { %v1448_v40 = vld [vmem:[%s2065_s23 + $0x18] sm:$0xf0]  ;;  %v1447_v41 = vor.u32 %v1726_v38, %v1446_v37  ;;  %v1438_v43 = vld [vmem:[%s2065_s23] sm:$0xf]  ;;  %v1724_v44 = vld [vmem:[%s2065_s23 + $0x4] sm:$0xf0] }
  0x2e   : > { %v1451_v42 = vor.u32 %v1725_v39, %v1448_v40  ;;  %v1723_v45 = vld [vmem:[%s2065_s23 + $0x4] sm:$0xf]  ;;  %v1440_v46 = vld [vmem:[%s2065_s23 + $0x8] sm:$0xf0]  ;;  %v1439_v47 = vor.u32 %v1724_v44, %v1438_v43  ;;  %v226_v49 = vld [vmem:[%s2060_s20] sm:$0xf] }
  0x2f   : > { %325 = vmatpush.bf16.msra.mxu0 %v1479_v17  ;;  %v1443_v48 = vor.u32 %v1723_v45, %v1440_v46  ;;  %v224_v50 = vld [vmem:[#allocation2] sm:$0xff]  ;;  %v225_v51 = vld [vmem:[#allocation2 + $0x8] sm:$0xff]  ;;  %p1500_p2 = scmp.ne.s32.totalorder %s1933_s15, 1 }
  0x30   : > { %338 = vmatpush.bf16.msra.mxu1 %v1483_v18  ;;  %s1952_s23 = smov (!%p1500_p2), 115   ;;  %s1953_s30 = smov (!%p1500_p2), 79  }
  0x31   : > { %s1954_s11 = smov (!%p1500_p2), 124   ;;  %s1955_s8 = smov (!%p1500_p2), 4  }
  0x32   : > { %s1956_s9 = smov (!%p1500_p2), 49   ;;  %s1957_s10 = smov (!%p1500_p2), 13  }
  0x33   : > { %326 = vmatpush.bf16.msra.mxu0 %v1471_v23 }
  0x34   : > { %339 = vmatpush.bf16.msra.mxu1 %v1475_v24 }
  0x37   : > { %327 = vmatpush.bf16.msra.mxu0 %v1463_v29 }
  0x38   : > { %340 = vmatpush.bf16.msra.mxu1 %v1467_v30 }
  0x3b   : > { %328 = vmatpush.bf16.msra.mxu0 %v1455_v35 }
  0x3c   : > { %341 = vmatpush.bf16.msra.mxu1 %v1459_v36 }
  0x3f   : > { %329 = vmatpush.bf16.msra.mxu0 %v1447_v41 }
  0x40   : > { %342 = vmatpush.bf16.msra.mxu1 %v1451_v42 }
  0x43   : > { %330 = vmatpush.bf16.msra.mxu0 %v1439_v47 }
  0x44   : > { %343 = vmatpush.bf16.msra.mxu1 %v1443_v48 }
  0x46   : > { %331 = vmatmul.bf16.vlgmr.msra.gmra.mxu0 %v226_v49 }
  0x47   : > { %344 = vmatmul.bf16.vlgmr.msra.gmra.mxu1 %v226_v49 }
  0xc3   : > { %v332_v52 = vpop.f32.mrf.mxu0 }
  0xc4   : > { %v349_v53 = vadd.f32 %v332_v52, %v224_v50  ;;  %v345_v54 = vpop.f32.mrf.mxu1 }
  0xc5   : > { %v350_v55 = vadd.f32 %v345_v54, %v225_v51 }
  0xc6   : > { %351 = vst [vmem:[#allocation2] sm:$0xff] %v349_v53 }
  0xc7   : > { %352 = vst [vmem:[#allocation2 + $0x8] sm:$0xff] %v350_v55 }
  0xc8   : > { %356 = sbr.rel (%p1500_p2) target bundleno = 710 (0x2c6), region = 40 }
  0xcb   : > { %v334_v56 = vpop.f32.mrf.mxu0 }
  0xcc   : > { %v347_v57 = vpop.f32.mrf.mxu1 }
  0xcd   : > { %v357_v58 = vld [vmem:[#allocation2] sm:$0xff]  ;;  %vm441_vm0 = vcmask 1043456   ;;  %v1741_v62 = vld [vmem:[%s2504_s2 + $0x10] sm:$0xff]  ;;  %vm416_vm1 = vcmask 64512   ;;  %v1744_v3 = vld [vmem:[%s2504_s2 + $0x28] sm:$0xff]  ;;  %vm1055_vm2 = vcmask 646144  }
  0xce   : > { %v359_v59 = vpack.c.bf16 %v357_v58, %v357_v58  ;;  %v1743_v61 = vld [vmem:[%s2504_s2 + $0x20] sm:$0xff]  ;;  %v358_v63 = vld [vmem:[#allocation2 + $0x8] sm:$0xff]  ;;  %v1745_v0 = vld [vmem:[%s2504_s2 + $0x30] sm:$0xff]  ;;  %vm510_vm3 = vcmask 27648   ;;  %vm743_vm4 = vcmask 101408   ;;  %vm975_vm5 = vcmask 396392  }
  0xcf   : > { %v1739_v1 = vld [vmem:[%s2504_s2] sm:$0xff]  ;;  %v992_v2 = vpack.c.bf16 %v358_v63, %v358_v63  ;;  %v1742_v4 = vld [vmem:[%s2504_s2 + $0x18] sm:$0xff]  ;;  %v1740_v6 = vld [vmem:[%s2504_s2 + $0x8] sm:$0xff]  ;;  %vm1298_vm6 = vcmask 1043848   ;;  %vm1299_vm7 = vcmask 1047556   ;;  %vm1265_vm9 = vcmask 400384  }
  0xd0   : > { %817 = vrot.lane.b32.xlu1 %v359_v59, %s1952_s23  ;;  %1051 = vrot.lane.b32.xlu0 %v359_v59, %s1953_s30  ;;  %v443_v60 = vsel %vm441_vm0, %v359_v59, 0  ;;  %v1746_v5 = vld [vmem:[%s2504_s2 + $0x38] sm:$0xff]  ;;  %v1755_v10 = vld [vmem:[%s2504_s2 + $0x80] sm:$0xff]  ;;  %vm2328_vm8 = vmor %vm1299_vm7, %vm1298_vm6 }
  0xd1   : > { %1773 = vmatpush.bf16.msra.mxu2 %v443_v60  ;;  %1772 = vmatpush.bf16.msra.mxu1 %v443_v60  ;;  %v1747_v16 = vld [vmem:[%s2504_s2 + $0x40] sm:$0xff]  ;;  %v1756_v19 = vld [vmem:[%s2504_s2 + $0x88] sm:$0xff]  ;;  %v1757_v22 = vld [vmem:[%s2504_s2 + $0x90] sm:$0xff] }
  0xd2   : > { %1774 = vmatpush.bf16.msra.mxu3 %v443_v60  ;;  %452 = vmatpush.bf16.msra.mxu0 %v443_v60  ;;  %v1763_v17 = vld [vmem:[%s2504_s2 + $0xc0] sm:$0xff]  ;;  %v1748_v20 = vld [vmem:[%s2504_s2 + $0x48] sm:$0xff]  ;;  %v1749_v23 = vld [vmem:[%s2504_s2 + $0x50] sm:$0xff] }
  0xd3   : > { %v1764_v21 = vld [vmem:[%s2504_s2 + $0xc8] sm:$0xff]  ;;  %v1765_v24 = vld [vmem:[%s2504_s2 + $0xd0] sm:$0xff]  ;;  %v1758_v25 = vld [vmem:[%s2504_s2 + $0x98] sm:$0xff] }
  0xd4   : > { %1537 = vmatmul.msk.bf16.vlgmr.msra.gmra.mxu2 %vm416_vm1, %v1743_v61  ;;  %1535 = vmatmul.msk.bf16.vlgmr.msra.gmra.mxu1 %vm416_vm1, %v1741_v62  ;;  %v1750_v26 = vld [vmem:[%s2504_s2 + $0x58] sm:$0xff]  ;;  %v1759_v28 = vld [vmem:[%s2504_s2 + $0xa0] sm:$0xff]  ;;  %v1760_v43 = vld [vmem:[%s2504_s2 + $0xa8] sm:$0xff] }
  0xd5   : > { %1539 = vmatmul.msk.bf16.vlgmr.msra.gmra.mxu3 %vm416_vm1, %v1745_v0  ;;  %1533 = vmatmul.msk.bf16.vlgmr.msra.gmra.mxu0 %vm416_vm1, %v1739_v1  ;;  %v1766_v27 = vld [vmem:[%s2504_s2 + $0xd8] sm:$0xff]  ;;  %v1751_v33 = vld [vmem:[%s2504_s2 + $0x60] sm:$0xff]  ;;  %v1752_v52 = vld [vmem:[%s2504_s2 + $0x68] sm:$0xff] }
  0xd6   : > { %v1767_v34 = vld [vmem:[%s2504_s2 + $0xe0] sm:$0xff]  ;;  %v1768_v53 = vld [vmem:[%s2504_s2 + $0xe8] sm:$0xff]  ;;  %v1761_v62 = vld [vmem:[%s2504_s2 + $0xb0] sm:$0xff] }
  0xd8   : > { %585 = vrot.lane.b32.xlu1 %v359_v59, %s1954_s11  ;;  %1053 = vrot.lane.b32.xlu0 %v992_v2, %s1953_s30 }
  0xe4   : > { %1538 = vmatmul.msk.bf16.gmra.mxu2 %vm416_vm1, %v1744_v3  ;;  %1536 = vmatmul.msk.bf16.gmra.mxu1 %vm416_vm1, %v1742_v4  ;;  %v1753_v3 = vld [vmem:[%s2504_s2 + $0x70] sm:$0xff] }
  0xe5   : > { %1540 = vmatmul.msk.bf16.gmra.mxu3 %vm416_vm1, %v1746_v5  ;;  %1534 = vmatmul.msk.bf16.gmra.mxu0 %vm416_vm1, %v1740_v6  ;;  %v1769_v4 = vld [vmem:[%s2504_s2 + $0xf0] sm:$0xff]  ;;  %v1762_v5 = vld [vmem:[%s2504_s2 + $0xb8] sm:$0xff] }
  0xe6   : > { %v1754_v6 = vld [vmem:[%s2504_s2 + $0x78] sm:$0xff] }
 0x142   : > { %v818_v7 = vpop.permute.xlu1 %817  ;;  %v1052_v8 = vpop.permute.xlu0 %1051 }
 0x143   : > { %v844_v9 = vsel %vm441_vm0, %v818_v7, 0  ;;  %v1770_v7 = vld [vmem:[%s2504_s2 + $0xf8] sm:$0xff] }
 0x144   : > { %853 = vmatpush.bf16.msrb.mxu2 %v844_v9 }
 0x147   : > { %1645 = vmatmul.msk.bf16.vlgmr.msrb.gmra.mxu2 %vm416_vm1, %v1755_v10 }
 0x14a   : > { %v586_v11 = vpop.permute.xlu1 %585  ;;  %v1054_v12 = vpop.permute.xlu0 %1053 }
 0x14b   : > { %v612_v13 = vsel %vm441_vm0, %v586_v11, 0  ;;  %v1056_v14 = vsel %vm1055_vm2, %v1052_v8, %v1054_v12  ;;  %v1085_v15 = vsel %vm441_vm0, %v1054_v12, 0 }
 0x14c   : > { %621 = vmatpush.bf16.msrb.mxu1 %v612_v13  ;;  %v1082_v18 = vsel %vm441_vm0, %v1056_v14, 0  ;;  %1143 = vmatpush.bf16.msrb.mxu0 %v1085_v15 }
 0x14d   : > { %1094 = vmatpush.bf16.msrb.mxu3 %v1082_v18 }
 0x14f   : > { %1589 = vmatmul.msk.bf16.vlgmr.msrb.gmra.mxu1 %vm416_vm1, %v1747_v16  ;;  %1709 = vmatmul.msk.bf16.vlgmr.msrb.gmra.mxu0 %vm416_vm1, %v1763_v17 }
 0x150   : > { %1701 = vmatmul.msk.bf16.vlgmr.msrb.gmra.mxu3 %vm416_vm1, %v1763_v17 }
 0x151   : > { %v464_v29 = vpop.f32.mrf.mxu1 }
 0x152   : > { %v498_v31 = vpack.c.bf16 %v464_v29, %v464_v29  ;;  %v454_v35 = vpop.f32.mrf.mxu0 }
 0x153   : > { %v494_v40 = vpack.c.bf16 %v454_v35, %v454_v35 }
 0x154   : > { %515 = vst.msk [vmem:[%s2067_s29 + $0x20] sm:$0xf] %vm510_vm3, %v498_v31 }
 0x155   : > { %511 = vst.msk [vmem:[%s2067_s29] sm:$0xf] %vm510_vm3, %v494_v40 }
 0x157   : > { %1646 = vmatmul.msk.bf16.gmra.mxu2 %vm416_vm1, %v1756_v19  ;;  %v474_v30 = vpop.f32.mrf.mxu2 }
 0x158   : > { %v502_v32 = vpack.c.bf16 %v474_v30, %v474_v30  ;;  %v484_v36 = vpop.f32.mrf.mxu3 }
 0x159   : > { %v466_v37 = vpop.f32.mrf.mxu1  ;;  %v506_v41 = vpack.c.bf16 %v484_v36, %v484_v36 }
 0x15a   : > { %519 = vst.msk [vmem:[%s2067_s29 + $0x40] sm:$0xf] %vm510_vm3, %v502_v32  ;;  %v499_v39 = vpack.c.bf16 %v466_v37, %v466_v37  ;;  %v456_v44 = vpop.f32.mrf.mxu0 }
 0x15b   : > { %523 = vst.msk [vmem:[%s2067_s29 + $0x60] sm:$0xf] %vm510_vm3, %v506_v41  ;;  %v495_v46 = vpack.c.bf16 %v456_v44, %v456_v44 }
 0x15c   : > { %516 = vst.msk [vmem:[%s2067_s29 + $0x28] sm:$0xf] %vm510_vm3, %v499_v39 }
 0x15d   : > { %512 = vst.msk [vmem:[%s2067_s29 + $0x8] sm:$0xf] %vm510_vm3, %v495_v46 }
 0x15f   : > { %1590 = vmatmul.msk.bf16.gmra.mxu1 %vm416_vm1, %v1748_v20  ;;  %1710 = vmatmul.msk.bf16.gmra.mxu0 %vm416_vm1, %v1764_v21  ;;  %v476_v38 = vpop.f32.mrf.mxu2 }
 0x160   : > { %1702 = vmatmul.msk.bf16.gmra.mxu3 %vm416_vm1, %v1764_v21  ;;  %v503_v42 = vpack.c.bf16 %v476_v38, %v476_v38  ;;  %v486_v45 = vpop.f32.mrf.mxu3 }
 0x161   : > { %v507_v47 = vpack.c.bf16 %v486_v45, %v486_v45  ;;  %v469_v48 = vpop.f32.mrf.mxu1 }
 0x162   : > { %520 = vst.msk [vmem:[%s2067_s29 + $0x48] sm:$0xf] %vm510_vm3, %v503_v42  ;;  %v500_v50 = vpack.c.bf16 %v469_v48, %v469_v48  ;;  %v459_v54 = vpop.f32.mrf.mxu0 }
 0x163   : > { %524 = vst.msk [vmem:[%s2067_s29 + $0x68] sm:$0xf] %vm510_vm3, %v507_v47  ;;  %v496_v59 = vpack.c.bf16 %v459_v54, %v459_v54 }
 0x164   : > { %517 = vst.msk [vmem:[%s2067_s29 + $0x30] sm:$0xf] %vm510_vm3, %v500_v50 }
 0x165   : > { %513 = vst.msk [vmem:[%s2067_s29 + $0x10] sm:$0xf] %vm510_vm3, %v496_v59 }
 0x167   : > { %1647 = vmatmul.msk.bf16.gmra.mxu2 %vm416_vm1, %v1757_v22  ;;  %v479_v49 = vpop.f32.mrf.mxu2 }
 0x168   : > { %v504_v51 = vpack.c.bf16 %v479_v49, %v479_v49  ;;  %v489_v55 = vpop.f32.mrf.mxu3 }
 0x169   : > { %v471_v56 = vpop.f32.mrf.mxu1  ;;  %v508_v60 = vpack.c.bf16 %v489_v55, %v489_v55 }
 0x16a   : > { %521 = vst.msk [vmem:[%s2067_s29 + $0x50] sm:$0xf] %vm510_vm3, %v504_v51  ;;  %v501_v58 = vpack.c.bf16 %v471_v56, %v471_v56  ;;  %v461_v63 = vpop.f32.mrf.mxu0 }
 0x16b   : > { %525 = vst.msk [vmem:[%s2067_s29 + $0x70] sm:$0xf] %vm510_vm3, %v508_v60  ;;  %v497_v1 = vpack.c.bf16 %v461_v63, %v461_v63 }
 0x16c   : > { %518 = vst.msk [vmem:[%s2067_s29 + $0x38] sm:$0xf] %vm510_vm3, %v501_v58 }
 0x16d   : > { %514 = vst.msk [vmem:[%s2067_s29 + $0x18] sm:$0xf] %vm510_vm3, %v497_v1 }
 0x16f   : > { %1591 = vmatmul.msk.bf16.gmra.mxu1 %vm416_vm1, %v1749_v23  ;;  %1711 = vmatmul.msk.bf16.gmra.mxu0 %vm416_vm1, %v1765_v24  ;;  %v481_v57 = vpop.f32.mrf.mxu2 }
 0x170   : > { %1703 = vmatmul.msk.bf16.gmra.mxu3 %vm416_vm1, %v1765_v24  ;;  %v505_v61 = vpack.c.bf16 %v481_v57, %v481_v57  ;;  %v491_v0 = vpop.f32.mrf.mxu3 }
 0x171   : > { %v509_v2 = vpack.c.bf16 %v491_v0, %v491_v0 }
 0x172   : > { %522 = vst.msk [vmem:[%s2067_s29 + $0x58] sm:$0xf] %vm510_vm3, %v505_v61 }
 0x173   : > { %526 = vst.msk [vmem:[%s2067_s29 + $0x78] sm:$0xf] %vm510_vm3, %v509_v2 }
 0x177   : > { %1648 = vmatmul.msk.bf16.gmra.mxu2 %vm416_vm1, %v1758_v25 }
 0x17f   : > { %1592 = vmatmul.msk.bf16.gmra.mxu1 %vm416_vm1, %v1750_v26  ;;  %1712 = vmatmul.msk.bf16.gmra.mxu0 %vm416_vm1, %v1766_v27 }
 0x180   : > { %1704 = vmatmul.msk.bf16.gmra.mxu3 %vm416_vm1, %v1766_v27 }
 0x187   : > { %1649 = vmatmul.msk.bf16.gmra.mxu2 %vm416_vm1, %v1759_v28 }
 0x18f   : > { %1593 = vmatmul.msk.bf16.gmra.mxu1 %vm416_vm1, %v1751_v33  ;;  %1713 = vmatmul.msk.bf16.gmra.mxu0 %vm416_vm1, %v1767_v34 }
 0x190   : > { %1705 = vmatmul.msk.bf16.gmra.mxu3 %vm416_vm1, %v1767_v34 }
 0x197   : > { %1650 = vmatmul.msk.bf16.gmra.mxu2 %vm416_vm1, %v1760_v43 }
 0x19f   : > { %1594 = vmatmul.msk.bf16.gmra.mxu1 %vm416_vm1, %v1752_v52  ;;  %1714 = vmatmul.msk.bf16.gmra.mxu0 %vm416_vm1, %v1768_v53 }
 0x1a0   : > { %1706 = vmatmul.msk.bf16.gmra.mxu3 %vm416_vm1, %v1768_v53 }
 0x1a7   : > { %1651 = vmatmul.msk.bf16.gmra.mxu2 %vm416_vm1, %v1761_v62 }
 0x1af   : > { %1595 = vmatmul.msk.bf16.gmra.mxu1 %vm416_vm1, %v1753_v3  ;;  %1715 = vmatmul.msk.bf16.gmra.mxu0 %vm416_vm1, %v1769_v4 }
 0x1b0   : > { %1707 = vmatmul.msk.bf16.gmra.mxu3 %vm416_vm1, %v1769_v4 }
 0x1b7   : > { %1652 = vmatmul.msk.bf16.gmra.mxu2 %vm416_vm1, %v1762_v5 }
 0x1bf   : > { %1596 = vmatmul.msk.bf16.gmra.mxu1 %vm416_vm1, %v1754_v6  ;;  %1716 = vmatmul.msk.bf16.gmra.mxu0 %vm416_vm1, %v1770_v7 }
 0x1c0   : > { %1708 = vmatmul.msk.bf16.gmra.mxu3 %vm416_vm1, %v1770_v7 }
 0x1ca   : > { %v855_v8 = vpop.f32.mrf.mxu2 }
 0x1cb   : > { %v895_v17 = vpack.c.bf16 %v855_v8, %v855_v8 }
 0x1cc   : > { %v623_v9 = vpop.f32.mrf.mxu1  ;;  %v1145_v10 = vpop.f32.mrf.mxu0 }
 0x1cd   : > { %v663_v11 = vpack.c.bf16 %v623_v9, %v623_v9 }
 0x1cf   : > { %695 = vrot.lane.b32.xlu2 %v663_v11, %s1955_s8 }
 0x1d2   : > { %v857_v12 = vpop.f32.mrf.mxu2 }
 0x1d3   : > { %v1096_v13 = vpop.f32.mrf.mxu3  ;;  %v896_v20 = vpack.c.bf16 %v857_v12, %v857_v12 }
 0x1d4   : > { %v1185_v14 = vpack.c.bf16 %v1145_v10, %v1096_v13  ;;  %v625_v15 = vpop.f32.mrf.mxu1  ;;  %v1147_v16 = vpop.f32.mrf.mxu0 }
 0x1d5   : > { %v664_v24 = vpack.c.bf16 %v625_v15, %v625_v15 }
 0x1d6   : > { %1217 = vrot.lane.b32.xlu0 %v1185_v14, %s1956_s9 }
 0x1d7   : > { %927 = vrot.lane.b32.xlu2 %v895_v17, %s1957_s10 }
 0x1da   : > { %v860_v18 = vpop.f32.mrf.mxu2 }
 0x1db   : > { %v1098_v19 = vpop.f32.mrf.mxu3  ;;  %v897_v27 = vpack.c.bf16 %v860_v18, %v860_v18 }
 0x1dc   : > { %v1186_v21 = vpack.c.bf16 %v1147_v16, %v1098_v19  ;;  %v628_v22 = vpop.f32.mrf.mxu1  ;;  %v1150_v23 = vpop.f32.mrf.mxu0 }
 0x1dd   : > { %v665_v28 = vpack.c.bf16 %v628_v22, %v628_v22 }
 0x1de   : > { %929 = vrot.lane.b32.xlu0 %v896_v20, %s1957_s10  ;;  %1219 = vrot.lane.b32.xlu1 %v1186_v21, %s1956_s9 }
 0x1df   : > { %697 = vrot.lane.b32.xlu2 %v664_v24, %s1955_s8 }
 0x1e2   : > { %v862_v25 = vpop.f32.mrf.mxu2 }
 0x1e3   : > { %v1101_v26 = vpop.f32.mrf.mxu3  ;;  %v898_v38 = vpack.c.bf16 %v862_v25, %v862_v25 }
 0x1e4   : > { %v1187_v29 = vpack.c.bf16 %v1150_v23, %v1101_v26  ;;  %v630_v30 = vpop.f32.mrf.mxu1  ;;  %v1152_v31 = vpop.f32.mrf.mxu0 }
 0x1e5   : > { %v666_v34 = vpack.c.bf16 %v630_v30, %v630_v30 }
 0x1e6   : > { %699 = vrot.lane.b32.xlu0 %v665_v28, %s1955_s8  ;;  %931 = vrot.lane.b32.xlu1 %v897_v27, %s1957_s10 }
 0x1e7   : > { %1221 = vrot.lane.b32.xlu2 %v1187_v29, %s1956_s9 }
 0x1ea   : > { %v865_v32 = vpop.f32.mrf.mxu2 }
 0x1eb   : > { %v1103_v33 = vpop.f32.mrf.mxu3  ;;  %v899_v41 = vpack.c.bf16 %v865_v32, %v865_v32 }
 0x1ec   : > { %v1188_v35 = vpack.c.bf16 %v1152_v31, %v1103_v33  ;;  %v633_v36 = vpop.f32.mrf.mxu1  ;;  %v1155_v37 = vpop.f32.mrf.mxu0 }
 0x1ed   : > { %v667_v45 = vpack.c.bf16 %v633_v36, %v633_v36 }
 0x1ee   : > { %701 = vrot.lane.b32.xlu1 %v666_v34, %s1955_s8  ;;  %1223 = vrot.lane.b32.xlu0 %v1188_v35, %s1956_s9 }
 0x1ef   : > { %933 = vrot.lane.b32.xlu2 %v898_v38, %s1957_s10 }
 0x1f2   : > { %v867_v39 = vpop.f32.mrf.mxu2 }
 0x1f3   : > { %v1106_v40 = vpop.f32.mrf.mxu3  ;;  %v900_v49 = vpack.c.bf16 %v867_v39, %v867_v39 }
 0x1f4   : > { %v1189_v42 = vpack.c.bf16 %v1155_v37, %v1106_v40  ;;  %v635_v43 = vpop.f32.mrf.mxu1  ;;  %v1157_v44 = vpop.f32.mrf.mxu0 }
 0x1f5   : > { %v668_v48 = vpack.c.bf16 %v635_v43, %v635_v43 }
 0x1f6   : > { %935 = vrot.lane.b32.xlu0 %v899_v41, %s1957_s10  ;;  %1225 = vrot.lane.b32.xlu1 %v1189_v42, %s1956_s9 }
 0x1f7   : > { %703 = vrot.lane.b32.xlu2 %v667_v45, %s1955_s8 }
 0x1fa   : > { %v870_v46 = vpop.f32.mrf.mxu2 }
 0x1fb   : > { %v1108_v47 = vpop.f32.mrf.mxu3  ;;  %v901_v59 = vpack.c.bf16 %v870_v46, %v870_v46 }
 0x1fc   : > { %v1190_v50 = vpack.c.bf16 %v1157_v44, %v1108_v47  ;;  %v638_v51 = vpop.f32.mrf.mxu1  ;;  %v1160_v52 = vpop.f32.mrf.mxu0 }
 0x1fd   : > { %v669_v55 = vpack.c.bf16 %v638_v51, %v638_v51 }
 0x1fe   : > { %705 = vrot.lane.b32.xlu0 %v668_v48, %s1955_s8  ;;  %937 = vrot.lane.b32.xlu1 %v900_v49, %s1957_s10 }
 0x1ff   : > { %1227 = vrot.lane.b32.xlu2 %v1190_v50, %s1956_s9 }
 0x202   : > { %v872_v53 = vpop.f32.mrf.mxu2 }
 0x203   : > { %v1111_v54 = vpop.f32.mrf.mxu3  ;;  %v902_v62 = vpack.c.bf16 %v872_v53, %v872_v53 }
 0x204   : > { %v1191_v56 = vpack.c.bf16 %v1160_v52, %v1111_v54  ;;  %v640_v57 = vpop.f32.mrf.mxu1  ;;  %v1162_v58 = vpop.f32.mrf.mxu0 }
 0x205   : > { %v670_v2 = vpack.c.bf16 %v640_v57, %v640_v57 }
 0x206   : > { %707 = vrot.lane.b32.xlu1 %v669_v55, %s1955_s8  ;;  %1229 = vrot.lane.b32.xlu0 %v1191_v56, %s1956_s9 }
 0x207   : > { %939 = vrot.lane.b32.xlu2 %v901_v59, %s1957_s10 }
 0x20a   : > { %v875_v60 = vpop.f32.mrf.mxu2 }
 0x20b   : > { %v1113_v61 = vpop.f32.mrf.mxu3  ;;  %v903_v6 = vpack.c.bf16 %v875_v60, %v875_v60 }
 0x20c   : > { %v1192_v63 = vpack.c.bf16 %v1162_v58, %v1113_v61  ;;  %v643_v0 = vpop.f32.mrf.mxu1  ;;  %v1165_v1 = vpop.f32.mrf.mxu0 }
 0x20d   : > { %v671_v5 = vpack.c.bf16 %v643_v0, %v643_v0 }
 0x20e   : > { %941 = vrot.lane.b32.xlu0 %v902_v62, %s1957_s10  ;;  %1231 = vrot.lane.b32.xlu1 %v1192_v63, %s1956_s9 }
 0x20f   : > { %709 = vrot.lane.b32.xlu2 %v670_v2, %s1955_s8 }
 0x212   : > { %v877_v3 = vpop.f32.mrf.mxu2 }
 0x213   : > { %v1116_v4 = vpop.f32.mrf.mxu3  ;;  %v904_v16 = vpack.c.bf16 %v877_v3, %v877_v3 }
 0x214   : > { %v1193_v7 = vpack.c.bf16 %v1165_v1, %v1116_v4  ;;  %v645_v8 = vpop.f32.mrf.mxu1  ;;  %v1167_v9 = vpop.f32.mrf.mxu0 }
 0x215   : > { %v672_v12 = vpack.c.bf16 %v645_v8, %v645_v8 }
 0x216   : > { %711 = vrot.lane.b32.xlu0 %v671_v5, %s1955_s8  ;;  %943 = vrot.lane.b32.xlu1 %v903_v6, %s1957_s10 }
 0x217   : > { %1233 = vrot.lane.b32.xlu2 %v1193_v7, %s1956_s9 }
 0x21a   : > { %v880_v10 = vpop.f32.mrf.mxu2 }
 0x21b   : > { %v1118_v11 = vpop.f32.mrf.mxu3  ;;  %v905_v19 = vpack.c.bf16 %v880_v10, %v880_v10 }
 0x21c   : > { %v1194_v13 = vpack.c.bf16 %v1167_v9, %v1118_v11  ;;  %v648_v14 = vpop.f32.mrf.mxu1  ;;  %v1170_v15 = vpop.f32.mrf.mxu0 }
 0x21d   : > { %v673_v23 = vpack.c.bf16 %v648_v14, %v648_v14 }
 0x21e   : > { %713 = vrot.lane.b32.xlu1 %v672_v12, %s1955_s8  ;;  %1235 = vrot.lane.b32.xlu0 %v1194_v13, %s1956_s9 }
 0x21f   : > { %945 = vrot.lane.b32.xlu2 %v904_v16, %s1957_s10 }
 0x222   : > { %v882_v17 = vpop.f32.mrf.mxu2 }
 0x223   : > { %v1121_v18 = vpop.f32.mrf.mxu3  ;;  %v906_v28 = vpack.c.bf16 %v882_v17, %v882_v17 }
 0x224   : > { %v1195_v20 = vpack.c.bf16 %v1170_v15, %v1121_v18  ;;  %v650_v21 = vpop.f32.mrf.mxu1  ;;  %v1172_v22 = vpop.f32.mrf.mxu0 }
 0x225   : > { %v674_v27 = vpack.c.bf16 %v650_v21, %v650_v21 }
 0x226   : > { %947 = vrot.lane.b32.xlu0 %v905_v19, %s1957_s10  ;;  %1237 = vrot.lane.b32.xlu1 %v1195_v20, %s1956_s9 }
 0x227   : > { %715 = vrot.lane.b32.xlu2 %v673_v23, %s1955_s8 }
 0x229   : > { %v696_v24 = vpop.permute.xlu2 %695 }
 0x22a   : > { %v885_v25 = vpop.f32.mrf.mxu2  ;;  %744 = vst.msk [vmem:[%s2067_s29] sm:$0xf] %vm743_vm4, %v696_v24 }
 0x22b   : > { %v1123_v26 = vpop.f32.mrf.mxu3  ;;  %v907_v38 = vpack.c.bf16 %v885_v25, %v885_v25 }
 0x22c   : > { %v653_v29 = vpop.f32.mrf.mxu1  ;;  %v1196_v30 = vpack.c.bf16 %v1172_v22, %v1123_v26  ;;  %v1175_v31 = vpop.f32.mrf.mxu0 }
 0x22d   : > { %v675_v35 = vpack.c.bf16 %v653_v29, %v653_v29 }
 0x22e   : > { %717 = vrot.lane.b32.xlu0 %v674_v27, %s1955_s8  ;;  %949 = vrot.lane.b32.xlu1 %v906_v28, %s1957_s10 }
 0x22f   : > { %1239 = vrot.lane.b32.xlu2 %v1196_v30, %s1956_s9 }
 0x231   : > { %v928_v32 = vpop.permute.xlu2 %927 }
 0x232   : > { %v887_v33 = vpop.f32.mrf.mxu2  ;;  %976 = vst.msk [vmem:[%s2067_s29] sm:$0xf] %vm975_vm5, %v928_v32 }
 0x233   : > { %v1126_v34 = vpop.f32.mrf.mxu3  ;;  %v908_v44 = vpack.c.bf16 %v887_v33, %v887_v33 }
 0x234   : > { %v655_v36 = vpop.f32.mrf.mxu1  ;;  %v1197_v37 = vpack.c.bf16 %v1175_v31, %v1126_v34  ;;  %v1177_v39 = vpop.f32.mrf.mxu0 }
 0x235   : > { %v676_v46 = vpack.c.bf16 %v655_v36, %v655_v36 }
 0x236   : > { %719 = vrot.lane.b32.xlu1 %v675_v35, %s1955_s8  ;;  %1241 = vrot.lane.b32.xlu0 %v1197_v37, %s1956_s9 }
 0x237   : > { %951 = vrot.lane.b32.xlu2 %v907_v38, %s1957_s10 }
 0x239   : > { %v698_v40 = vpop.permute.xlu2 %697 }
 0x23a   : > { %v890_v41 = vpop.f32.mrf.mxu2  ;;  %745 = vst.msk [vmem:[%s2067_s29 + $0x8] sm:$0xf] %vm743_vm4, %v698_v40 }
 0x23b   : > { %v909_v42 = vpack.c.bf16 %v890_v41, %v890_v41  ;;  %v1128_v43 = vpop.f32.mrf.mxu3 }
 0x23c   : > { %v658_v45 = vpop.f32.mrf.mxu1  ;;  %v1180_v48 = vpop.f32.mrf.mxu0  ;;  %v1198_v63 = vpack.c.bf16 %v1177_v39, %v1128_v43 }
 0x23d   : > { %v677_v51 = vpack.c.bf16 %v658_v45, %v658_v45 }
 0x23e   : > { %955 = vrot.lane.b32.xlu1 %v909_v42, %s1957_s10  ;;  %953 = vrot.lane.b32.xlu0 %v908_v44, %s1957_s10 }
 0x23f   : > { %721 = vrot.lane.b32.xlu2 %v676_v46, %s1955_s8 }
 0x241   : > { %v1222_v47 = vpop.permute.xlu2 %1221 }
 0x242   : > { %v892_v49 = vpop.f32.mrf.mxu2  ;;  %v1251_v6 = vrot.slane %v1222_v47, 4 }
 0x243   : > { %v1131_v50 = vpop.f32.mrf.mxu3  ;;  %v910_v54 = vpack.c.bf16 %v892_v49, %v892_v49 }
 0x244   : > { %v660_v52 = vpop.f32.mrf.mxu1  ;;  %v1182_v61 = vpop.f32.mrf.mxu0  ;;  %v1199_v0 = vpack.c.bf16 %v1180_v48, %v1131_v50  ;;  %v1268_v10 = vsel %vm1265_vm9, %v1251_v6, %v1222_v47 }
 0x245   : > { %v678_v53 = vpack.c.bf16 %v660_v52, %v660_v52 }
 0x246   : > { %723 = vrot.lane.b32.xlu0 %v677_v51, %s1955_s8 }
 0x247   : > { %725 = vrot.lane.b32.xlu1 %v678_v53, %s1955_s8  ;;  %957 = vrot.lane.b32.xlu2 %v910_v54, %s1957_s10 }
 0x248   : > { %v1218_v55 = vpop.permute.xlu0 %1217 }
 0x249   : > { %v1249_v57 = vrot.slane %v1218_v55, 4  ;;  %v934_v58 = vpop.permute.xlu2 %933 }
 0x24b   : > { %v1266_v59 = vsel %vm1265_vm9, %v1249_v57, %v1218_v55  ;;  %v1133_v60 = vpop.f32.mrf.mxu3 }
 0x24c   : > { %1301 = vst.msk [vmem:[%s2067_s29] sm:$0xff] %vm2328_vm8, %v1266_v59  ;;  %v1200_v62 = vpack.c.bf16 %v1182_v61, %v1133_v60 }
 0x24e   : > { %1247 = vrot.lane.b32.xlu0 %v1200_v62, %s1956_s9 }
 0x24f   : > { %1243 = vrot.lane.b32.xlu1 %v1198_v63, %s1956_s9  ;;  %1245 = vrot.lane.b32.xlu2 %v1199_v0, %s1956_s9 }
 0x250   : > { %v930_v1 = vpop.permute.xlu0 %929  ;;  %v1220_v2 = vpop.permute.xlu1 %1219 }
 0x251   : > { %977 = vst.msk [vmem:[%s2067_s29 + $0x8] sm:$0xf] %vm975_vm5, %v930_v1  ;;  %v1250_v3 = vrot.slane %v1220_v2, 4  ;;  %v704_v4 = vpop.permute.xlu2 %703 }
 0x252   : > { %748 = vst.msk [vmem:[%s2067_s29 + $0x20] sm:$0xf] %vm743_vm4, %v704_v4 }
 0x253   : > { %v1267_v5 = vsel %vm1265_vm9, %v1250_v3, %v1220_v2 }
 0x254   : > { %1302 = vst.msk [vmem:[%s2067_s29 + $0x8] sm:$0xff] %vm2328_vm8, %v1267_v5 }
 0x258   : > { %v700_v7 = vpop.permute.xlu0 %699  ;;  %v932_v8 = vpop.permute.xlu1 %931 }
 0x259   : > { %746 = vst.msk [vmem:[%s2067_s29 + $0x10] sm:$0xf] %vm743_vm4, %v700_v7  ;;  %v1228_v9 = vpop.permute.xlu2 %1227 }
 0x25a   : > { %978 = vst.msk [vmem:[%s2067_s29 + $0x10] sm:$0xf] %vm975_vm5, %v932_v8  ;;  %v1254_v21 = vrot.slane %v1228_v9, 4 }
 0x25b   : > { %1303 = vst.msk [vmem:[%s2067_s29 + $0x10] sm:$0xff] %vm2328_vm8, %v1268_v10 }
 0x25c   : > { %v1271_v25 = vsel %vm1265_vm9, %v1254_v21, %v1228_v9 }
 0x260   : > { %v702_v11 = vpop.permute.xlu1 %701  ;;  %v1224_v12 = vpop.permute.xlu0 %1223 }
 0x261   : > { %747 = vst.msk [vmem:[%s2067_s29 + $0x18] sm:$0xf] %vm743_vm4, %v702_v11  ;;  %v1252_v13 = vrot.slane %v1224_v12, 4  ;;  %v940_v14 = vpop.permute.xlu2 %939 }
 0x262   : > { %979 = vst.msk [vmem:[%s2067_s29 + $0x18] sm:$0xf] %vm975_vm5, %v934_v58 }
 0x263   : > { %v1269_v15 = vsel %vm1265_vm9, %v1252_v13, %v1224_v12 }
 0x264   : > { %1304 = vst.msk [vmem:[%s2067_s29 + $0x18] sm:$0xff] %vm2328_vm8, %v1269_v15 }
 0x268   : > { %v936_v16 = vpop.permute.xlu0 %935  ;;  %v1226_v17 = vpop.permute.xlu1 %1225 }
 0x269   : > { %980 = vst.msk [vmem:[%s2067_s29 + $0x20] sm:$0xf] %vm975_vm5, %v936_v16  ;;  %v1253_v18 = vrot.slane %v1226_v17, 4  ;;  %v710_v19 = vpop.permute.xlu2 %709 }
 0x26a   : > { %751 = vst.msk [vmem:[%s2067_s29 + $0x38] sm:$0xf] %vm743_vm4, %v710_v19 }
 0x26b   : > { %v1270_v20 = vsel %vm1265_vm9, %v1253_v18, %v1226_v17 }
 0x26c   : > { %1305 = vst.msk [vmem:[%s2067_s29 + $0x20] sm:$0xff] %vm2328_vm8, %v1270_v20 }
 0x270   : > { %v706_v22 = vpop.permute.xlu0 %705  ;;  %v938_v23 = vpop.permute.xlu1 %937 }
 0x271   : > { %749 = vst.msk [vmem:[%s2067_s29 + $0x28] sm:$0xf] %vm743_vm4, %v706_v22  ;;  %v1234_v24 = vpop.permute.xlu2 %1233 }
 0x272   : > { %981 = vst.msk [vmem:[%s2067_s29 + $0x28] sm:$0xf] %vm975_vm5, %v938_v23  ;;  %v1257_v36 = vrot.slane %v1234_v24, 4 }
 0x273   : > { %1306 = vst.msk [vmem:[%s2067_s29 + $0x28] sm:$0xff] %vm2328_vm8, %v1271_v25 }
 0x274   : > { %v1274_v40 = vsel %vm1265_vm9, %v1257_v36, %v1234_v24 }
 0x278   : > { %v708_v26 = vpop.permute.xlu1 %707  ;;  %v1230_v27 = vpop.permute.xlu0 %1229 }
 0x279   : > { %750 = vst.msk [vmem:[%s2067_s29 + $0x30] sm:$0xf] %vm743_vm4, %v708_v26  ;;  %v1255_v28 = vrot.slane %v1230_v27, 4  ;;  %v946_v29 = vpop.permute.xlu2 %945 }
 0x27a   : > { %982 = vst.msk [vmem:[%s2067_s29 + $0x30] sm:$0xf] %vm975_vm5, %v940_v14 }
 0x27b   : > { %v1272_v30 = vsel %vm1265_vm9, %v1255_v28, %v1230_v27 }
 0x27c   : > { %1307 = vst.msk [vmem:[%s2067_s29 + $0x30] sm:$0xff] %vm2328_vm8, %v1272_v30 }
 0x280   : > { %v942_v31 = vpop.permute.xlu0 %941  ;;  %v1232_v32 = vpop.permute.xlu1 %1231 }
 0x281   : > { %983 = vst.msk [vmem:[%s2067_s29 + $0x38] sm:$0xf] %vm975_vm5, %v942_v31  ;;  %v1256_v33 = vrot.slane %v1232_v32, 4  ;;  %v716_v34 = vpop.permute.xlu2 %715 }
 0x282   : > { %754 = vst.msk [vmem:[%s2067_s29 + $0x50] sm:$0xf] %vm743_vm4, %v716_v34 }
 0x283   : > { %v1273_v35 = vsel %vm1265_vm9, %v1256_v33, %v1232_v32 }
 0x284   : > { %1308 = vst.msk [vmem:[%s2067_s29 + $0x38] sm:$0xff] %vm2328_vm8, %v1273_v35 }
 0x288   : > { %v712_v37 = vpop.permute.xlu0 %711  ;;  %v944_v38 = vpop.permute.xlu1 %943 }
 0x289   : > { %752 = vst.msk [vmem:[%s2067_s29 + $0x40] sm:$0xf] %vm743_vm4, %v712_v37  ;;  %v1240_v39 = vpop.permute.xlu2 %1239 }
 0x28a   : > { %984 = vst.msk [vmem:[%s2067_s29 + $0x40] sm:$0xf] %vm975_vm5, %v944_v38  ;;  %v1260_v51 = vrot.slane %v1240_v39, 4 }
 0x28b   : > { %1309 = vst.msk [vmem:[%s2067_s29 + $0x40] sm:$0xff] %vm2328_vm8, %v1274_v40 }
 0x28c   : > { %v1277_v54 = vsel %vm1265_vm9, %v1260_v51, %v1240_v39 }
 0x290   : > { %v714_v41 = vpop.permute.xlu1 %713  ;;  %v1236_v42 = vpop.permute.xlu0 %1235 }
 0x291   : > { %753 = vst.msk [vmem:[%s2067_s29 + $0x48] sm:$0xf] %vm743_vm4, %v714_v41  ;;  %v1258_v43 = vrot.slane %v1236_v42, 4  ;;  %v952_v44 = vpop.permute.xlu2 %951 }
 0x292   : > { %985 = vst.msk [vmem:[%s2067_s29 + $0x48] sm:$0xf] %vm975_vm5, %v946_v29 }
 0x293   : > { %v1275_v45 = vsel %vm1265_vm9, %v1258_v43, %v1236_v42 }
 0x294   : > { %1310 = vst.msk [vmem:[%s2067_s29 + $0x48] sm:$0xff] %vm2328_vm8, %v1275_v45 }
 0x298   : > { %v948_v46 = vpop.permute.xlu0 %947  ;;  %v1238_v47 = vpop.permute.xlu1 %1237 }
 0x299   : > { %986 = vst.msk [vmem:[%s2067_s29 + $0x50] sm:$0xf] %vm975_vm5, %v948_v46  ;;  %v1259_v48 = vrot.slane %v1238_v47, 4  ;;  %v722_v49 = vpop.permute.xlu2 %721 }
 0x29a   : > { %757 = vst.msk [vmem:[%s2067_s29 + $0x68] sm:$0xf] %vm743_vm4, %v722_v49 }
 0x29b   : > { %v1276_v50 = vsel %vm1265_vm9, %v1259_v48, %v1238_v47 }
 0x29c   : > { %1311 = vst.msk [vmem:[%s2067_s29 + $0x50] sm:$0xff] %vm2328_vm8, %v1276_v50 }
 0x2a0   : > { %v718_v52 = vpop.permute.xlu0 %717  ;;  %v950_v53 = vpop.permute.xlu1 %949 }
 0x2a1   : > { %755 = vst.msk [vmem:[%s2067_s29 + $0x58] sm:$0xf] %vm743_vm4, %v718_v52  ;;  %v958_v60 = vpop.permute.xlu2 %957 }
 0x2a2   : > { %987 = vst.msk [vmem:[%s2067_s29 + $0x58] sm:$0xf] %vm975_vm5, %v950_v53 }
 0x2a3   : > { %1312 = vst.msk [vmem:[%s2067_s29 + $0x58] sm:$0xff] %vm2328_vm8, %v1277_v54 }
 0x2a8   : > { %v720_v55 = vpop.permute.xlu1 %719  ;;  %v1242_v57 = vpop.permute.xlu0 %1241 }
 0x2a9   : > { %756 = vst.msk [vmem:[%s2067_s29 + $0x60] sm:$0xf] %vm743_vm4, %v720_v55  ;;  %v1261_v58 = vrot.slane %v1242_v57, 4  ;;  %v1246_v63 = vpop.permute.xlu2 %1245 }
 0x2aa   : > { %988 = vst.msk [vmem:[%s2067_s29 + $0x60] sm:$0xf] %vm975_vm5, %v952_v44  ;;  %v1263_v0 = vrot.slane %v1246_v63, 4 }
 0x2ab   : > { %v1278_v59 = vsel %vm1265_vm9, %v1261_v58, %v1242_v57 }
 0x2ac   : > { %1313 = vst.msk [vmem:[%s2067_s29 + $0x60] sm:$0xff] %vm2328_vm8, %v1278_v59  ;;  %v1280_v3 = vsel %vm1265_vm9, %v1263_v0, %v1246_v63 }
 0x2b0   : > { %v956_v61 = vpop.permute.xlu1 %955  ;;  %v954_v62 = vpop.permute.xlu0 %953 }
 0x2b1   : > { %989 = vst.msk [vmem:[%s2067_s29 + $0x68] sm:$0xf] %vm975_vm5, %v954_v62 }
 0x2b8   : > { %v724_v1 = vpop.permute.xlu0 %723 }
 0x2b9   : > { %v726_v2 = vpop.permute.xlu1 %725  ;;  %758 = vst.msk [vmem:[%s2067_s29 + $0x70] sm:$0xf] %vm743_vm4, %v724_v1 }
 0x2ba   : > { %759 = vst.msk [vmem:[%s2067_s29 + $0x78] sm:$0xf] %vm743_vm4, %v726_v2 }
 0x2bb   : > { %991 = vst.msk [vmem:[%s2067_s29 + $0x78] sm:$0xf] %vm975_vm5, %v958_v60 }
 0x2bc   : > { %990 = vst.msk [vmem:[%s2067_s29 + $0x70] sm:$0xf] %vm975_vm5, %v956_v61 }
 0x2bd   : > { %1315 = vst.msk [vmem:[%s2067_s29 + $0x70] sm:$0xff] %vm2328_vm8, %v1280_v3 }
 0x2c0   : > { %v1248_v4 = vpop.permute.xlu0 %1247 }
 0x2c1   : > { %v1244_v5 = vpop.permute.xlu1 %1243  ;;  %v1264_v6 = vrot.slane %v1248_v4, 4 }
 0x2c2   : > { %v1262_v7 = vrot.slane %v1244_v5, 4 }
 0x2c3   : > { %v1281_v8 = vsel %vm1265_vm9, %v1264_v6, %v1248_v4 }
 0x2c4   : > { %v1279_v9 = vsel %vm1265_vm9, %v1262_v7, %v1244_v5  ;;  %1316 = vst.msk [vmem:[%s2067_s29 + $0x78] sm:$0xff] %vm2328_vm8, %v1281_v8 }
 0x2c5   : > { %1314 = vst.msk [vmem:[%s2067_s29 + $0x68] sm:$0xff] %vm2328_vm8, %v1279_v9 }
 0x2c6 PF: > { %s1771_s11 = sshll.u32 %s1937_s16, 7  ;;  %s1330_s27 = sshll.u32 %s2067_s29, 4  ;;  %s1331_s27 = int_to_ptr.vmem [resolvable:$true] %s1330_s27 }
 0x2c7   : > { %s1329_s26 = scalar_lea.hbm %s2505_s3, %s1771_s11  ;;  %s2513_s4 = sand.u32 1, %s1925_s13  }
 0x2c8   : > { %s1332_s23 = sshll.u32 %s1329_s26, 4  ;;  %s1318_s5 = scalar_lea.sflag [#allocation4], %s2513_s4  ;;  %s1333_s23 = int_to_ptr.hbm [resolvable:$true] %s1332_s23 }
 0x2c9   : > { %s1869_s30 = sshra.s32 %s1333_s23, 4  ;;  %s1875_s16 = scalar_lea.hbm %s2505_s3, 256  ;;  %s1870_s30 = int_to_ptr.hbm [resolvable:$true] %s1869_s30 }
 0x2ca   : > { %s1871_s6 = scalar_lea.hbm %s1870_s30, 128  ;;  %p1876_p7 = scmp.lt.s32.totalorder %s1870_s30, %s2505_s3 }
 0x2cb   : > { %p1872_p4 = scmp.ne.s32.totalorder %s1870_s30, %s1871_s6  ;;  %p1877_p8 = scmp.lt.s32.totalorder %s1875_s16, %s1871_s6 }
 0x2cd   : > { %p1873_p5 = pnand %p1872_p4, %p2029_p3  ;;  %p1878_p10 = por %p1877_p8, %p1876_p7 }
 0x2cf   : > { %p1874_p6 = pneg %p1873_p5 }
 0x2d1   : > { %p1879_p11 = pnand %p1878_p10, %p1874_p6 }
 0x2d3   : > { %1882 = shalt.err (!%p1879_p11)
}
 0x2d4   : > { %s1958_s29 = smov 128   ;;  %s1959_s10 = smov 8  }
 0x2d5   : > { %1775 = dma.vmem_to_hbm [thread:$0]  (%p2029_p3), %s1331_s27, 2048, %s1333_s23, %s1318_s5, %s1958_s29, %s1958_s29, %s1959_s10  }
 0x2d6 PF: > { %p1781_p12 = scmp.ge.s32.totalorder %s1949_s19, 2  ;;  %s1347_s11 = sand.u32 1, %s1921_s12  }
 0x2d7   : > { %s1348_s20 = scalar_lea.sflag [#allocation4], %s1347_s11 }
 0x2d8   : > { %p1778_p13 = pnand %p1781_p12, %p2039_p9 }
 0x2da   : > { %p1779_p0 = pneg %p1778_p13 }
 0x2dc   : > { %1916 = dma.done.wait (%p1779_p0), %s1348_s20, 2048  }
 0x2dd   : > { %1918 = vsyncadd (%p1779_p0), %s1348_s20, 4294965248  ;;  %s16_s19 = sadd.s32 1, %s1949_s19   ;;  %s2514_s24 = sld [smem:[#allocation6_spill]] }
 0x2de   : > { %p13_p1 = scmp.ge.s32.totalorder %s16_s19, 6   ;;  %s2515_s12 = smov %s1925_s13 }
 0x2df   : > { %s2516_s13 = smov %s1929_s14  ;;  %s2517_s14 = smov %s2047_s28 }
 0x2e0   : > { %s2518_s15 = smov %s1941_s17  ;;  %s2519_s16 = smov %s1945_s18 }
 0x2e1   : > { %s2520_s17 = smov %s2523_s22  ;;  %15 = sbr.rel (!%p13_p1) target bundleno = 5 (0x5), region = 81 }
 0x2e3   : > { %s2521_s18 = smov %s2514_s24 }
 0x2e6   :  { %1354 = vsyncpa [#allocation4], 1 }
 0x2e7   :  { %1356 = vsyncpa [#allocation4 + $0x1], 1 }

</bundles_post_ra>
